<compile_context>
chip_gen: v7x
topology: tpu7x:2x2x1
jax: 0.10.0
libtpu: 0.0.40
codegen_flags: <defaults>
</compile_context>

<pallas_src>
from functools import partial

import jax
import jax.numpy as jnp
from jax import lax
from jax.experimental import pallas as pl
from jax.experimental.pallas import tpu as pltpu


def _round_up(x, m):
    return (x + m - 1) // m * m


def embedding_model_kernel(lin_ref, cat_ref, tags_ref,
                           w_lin_ref, tab_oh_ref, tab_mh_ref,
                           w1_ref, b1_ref, w2_ref, b2_ref,
                           out_ref, cat_scr,
                           *, method_multihot, compute_dtype):
    f32 = jnp.float32
    cd = compute_dtype
    TB = lin_ref.shape[0]
    V, E = tab_oh_ref.shape
    M = tags_ref.shape[1]

    # ---- build one-hot / multi-hot count matrices in-register (no HBM one-hot) ----
    lane_ids = lax.broadcasted_iota(jnp.int32, (TB, V), 1)
    cat_idx = cat_ref[...]                                     # (TB, 1) int32
    oh = jnp.where(lane_ids == cat_idx, 1.0, 0.0).astype(cd)   # (TB, V)

    tags = tags_ref[...]                                       # (TB, M) int32
    counts = jnp.zeros((TB, V), f32)
    for m in range(M):                                         # M is small & static
        counts = counts + jnp.where(lane_ids == tags[:, m:m + 1], 1.0, 0.0)
    if method_multihot == "mean":
        counts = counts * (1.0 / M)
    mh = counts.astype(cd)

    # ---- per-feature embeddings (datamap order: linear, onehot, multihot) ----
    # (b_lin is folded into b1' offline)
    emb_lin = jnp.dot(lin_ref[...], w_lin_ref[...], preferred_element_type=f32)
    emb_oh = jnp.dot(oh, tab_oh_ref[...], preferred_element_type=f32)
    emb_mh = jnp.dot(mh, tab_mh_ref[...], preferred_element_type=f32)

    # ---- fused fc1: concat into one (TB, 3E) scratch, single K=3E matmul ----
    cat_scr[:, 0:E] = emb_lin.astype(cd)
    cat_scr[:, E:2 * E] = emb_oh.astype(cd)
    cat_scr[:, 2 * E:3 * E] = emb_mh.astype(cd)
    z = jnp.dot(cat_scr[...], w1_ref[...], preferred_element_type=f32) + b1_ref[...]
    h = jnp.maximum(z, 0.0).astype(cd)

    # ---- fc2 into a lane-dense (128-column padded) output tile ----
    out_ref[...] = jnp.dot(h, w2_ref[...], preferred_element_type=f32) + b2_ref[...]


def embedding_model_forward(x, params, *, embedding_dim, method_multihot="sum",
                            compute_dtype=jnp.bfloat16, tile_b=256):
    """x: lin_feat (B, NL) float, cat_feat (B,) int, tags (B, M) int."""
    if method_multihot not in ("sum", "mean"):
        raise NotImplementedError(method_multihot)

    lin, cat, tags = x["lin_feat"], x["cat_feat"], x["tags"]
    B, NL = lin.shape
    M = tags.shape[1]
    V, E = params["tab_onehot"].shape
    assert E == embedding_dim
    H = params["w1"].shape[1]
    O = params["w2"].shape[1]
    O_PAD = _round_up(max(O, 128), 128)

    cd = compute_dtype
    f32 = jnp.float32

    # batch tiling (multiple of 16 keeps bf16 sublane packing happy)
    TB = min(tile_b, _round_up(B, 16))
    B_pad = _round_up(B, TB)
    nb = B_pad // TB

    # ---- offline param prep: bias fold, bf16 casts, lane-dense output padding ----
    b1_f = (params["b1"].reshape(1, H)
            + params["b_lin"].reshape(1, E) @ params["w1"][0:E, :]).astype(f32)
    w_lin = params["w_lin"].astype(cd)
    tab_oh = params["tab_onehot"].astype(cd)
    tab_mh = params["tab_multihot"].astype(cd)
    w1 = params["w1"].astype(cd)
    w2p = jnp.zeros((H, O_PAD), cd).at[:, :O].set(params["w2"].astype(cd))
    b2p = jnp.zeros((1, O_PAD), f32).at[:, :O].set(params["b2"].reshape(1, O).astype(f32))

    # ---- input prep: pad batch to a tile multiple; indices stay int32 ----
    def pad_b(a):
        return jnp.pad(a, ((0, B_pad - B),) + ((0, 0),) * (a.ndim - 1))

    lin_p = pad_b(lin.astype(cd))
    cat_p = pad_b(cat.reshape(B, 1).astype(jnp.int32))
    tags_p = pad_b(tags.astype(jnp.int32))

    batch2 = lambda i: (i, 0)   # batch-tiled arrays
    const2 = lambda i: (0, 0)   # weights/tables: resident across grid steps

    in_specs = [
        pl.BlockSpec((TB, NL), batch2),        # lin_feat tile
        pl.BlockSpec((TB, 1), batch2),         # onehot indices
        pl.BlockSpec((TB, M), batch2),         # multihot indices
        pl.BlockSpec((NL, E), const2),         # w_lin
        pl.BlockSpec((V, E), const2),          # onehot table
        pl.BlockSpec((V, E), const2),          # multihot table
        pl.BlockSpec((3 * E, H), const2),      # w1
        pl.BlockSpec((1, H), const2),          # b1' (b_lin folded in)
        pl.BlockSpec((H, O_PAD), const2),      # w2 (zero-padded columns)
        pl.BlockSpec((1, O_PAD), const2),      # b2 (zero-padded columns)
    ]
    out_spec = pl.BlockSpec((TB, O_PAD), batch2)

    inputs = (lin_p, cat_p, tags_p, w_lin, tab_oh, tab_mh, w1, b1_f, w2p, b2p)
    flops = 2 * B_pad * (NL * E + 2 * V * E + 3 * E * H + H * O_PAD)
    bytes_accessed = (sum(int(a.size) * a.dtype.itemsize for a in inputs)
                      + B_pad * O_PAD * 4)

    out = pl.pallas_call(
        partial(embedding_model_kernel,
                method_multihot=method_multihot, compute_dtype=cd),
        out_shape=jax.ShapeDtypeStruct((B_pad, O_PAD), f32),
        grid=(nb,),
        in_specs=in_specs,
        out_specs=out_spec,
        scratch_shapes=[pltpu.VMEM((TB, 3 * E), cd)],
        compiler_params=pltpu.CompilerParams(
            dimension_semantics=("parallel",),
            vmem_limit_bytes=32 * 1024 * 1024),
        cost_estimate=pl.CostEstimate(flops=flops, transcendentals=0,
                                      bytes_accessed=bytes_accessed),
    )(*inputs)

    return out[:B, :O]


def make_params(key, *, num_linear_features, num_sparse_features,
                embedding_dim, hidden_dim, output_dim, n_features):
    ks = jax.random.split(key, 8)
    s = 0.1
    return {
        "w_lin": s * jax.random.normal(ks[0], (num_linear_features, embedding_dim), jnp.float32),
        "b_lin": s * jax.random.normal(ks[1], (1, embedding_dim), jnp.float32),
        "tab_onehot": s * jax.random.normal(ks[2], (num_sparse_features, embedding_dim), jnp.float32),
        "tab_multihot": s * jax.random.normal(ks[3], (num_sparse_features, embedding_dim), jnp.float32),
        "w1": s * jax.random.normal(ks[4], (embedding_dim * n_features, hidden_dim), jnp.float32),
        "b1": s * jax.random.normal(ks[5], (1, hidden_dim), jnp.float32),
        "w2": s * jax.random.normal(ks[6], (hidden_dim, output_dim), jnp.float32),
        "b2": s * jax.random.normal(ks[7], (1, output_dim), jnp.float32),
    }


def reference_forward(x, params, *, method_multihot="sum"):
    """Pure-JAX f32 reference reproducing the PyTorch forward."""
    emb_lin = x["lin_feat"] @ params["w_lin"] + params["b_lin"]
    emb_oh = params["tab_onehot"][x["cat_feat"]]
    gathered = params["tab_multihot"][x["tags"]]                       # (B, M, E)
    emb_mh = gathered.sum(axis=1) if method_multihot == "sum" else gathered.mean(axis=1)
    combined = jnp.concatenate([emb_lin, emb_oh, emb_mh], axis=1)
    h = jnp.maximum(combined @ params["w1"] + params["b1"], 0.0)
    return h @ params["w2"] + params["b2"]


if __name__ == "__main__":
    # model_config (small, consistent with the module)
    B = 8        # batch
    NL = 16      # num_linear_features
    V = 32       # num_sparse_features
    E = 32       # embedding_dim
    H = 64       # hidden_dim
    O = 8        # output_dim
    M = 4        # ids per multihot feature
    N_FEATURES = 3  # len(datamap) - 1 ('y' excluded)

    key = jax.random.PRNGKey(0)
    kp, kx1, kx2, kx3 = jax.random.split(key, 4)

    params = make_params(kp, num_linear_features=NL, num_sparse_features=V,
                         embedding_dim=E, hidden_dim=H, output_dim=O,
                         n_features=N_FEATURES)

    x = {
        "lin_feat": jax.random.normal(kx1, (B, NL), jnp.float32),
        "cat_feat": jax.random.randint(kx2, (B,), 0, V, jnp.int32),
        "tags": jax.random.randint(kx3, (B, M), 0, V, jnp.int32),
    }

    out = embedding_model_forward(x, params, embedding_dim=E, method_multihot="sum")
    out = jax.block_until_ready(out)

    ref = reference_forward(x, params, method_multihot="sum")
    assert out.shape == (B, O), out.shape
    # bf16 MXU operands vs f32 reference -> loosened tolerance
    max_err = float(jnp.max(jnp.abs(out - ref)))
    assert max_err < 3e-2, max_err

    print("KERNEL_OK")
</pallas_src>

<mosaic_0001>
module attributes {stable_mosaic.version = 11 : i64} {
  func.func @embedding_model_kernel(%arg0: i32, %arg1: memref<16x16xbf16, #tpu.memory_space<vmem>>, %arg2: memref<16x1xi32, #tpu.memory_space<vmem>>, %arg3: memref<16x4xi32, #tpu.memory_space<vmem>>, %arg4: memref<16x32xbf16, #tpu.memory_space<vmem>>, %arg5: memref<32x32xbf16, #tpu.memory_space<vmem>>, %arg6: memref<32x32xbf16, #tpu.memory_space<vmem>>, %arg7: memref<96x64xbf16, #tpu.memory_space<vmem>>, %arg8: memref<1x64xf32, #tpu.memory_space<vmem>>, %arg9: memref<64x128xbf16, #tpu.memory_space<vmem>>, %arg10: memref<1x128xf32, #tpu.memory_space<vmem>>, %arg11: memref<16x128xf32, #tpu.memory_space<vmem>>, %arg12: memref<16x96xbf16, #tpu.memory_space<vmem>>) attributes {dimension_semantics = [#tpu.dimension_semantics<parallel>], iteration_bounds = array<i64: 1>, scalar_prefetch = 0 : i64, scratch_operands = 1 : i64, tpu.core_type = #tpu.core_type<tc>, window_params = [{transform_indices = @transform_0, window_bounds = array<i64: 16, 16>}, {transform_indices = @transform_1, window_bounds = array<i64: 16, 1>}, {transform_indices = @transform_2, window_bounds = array<i64: 16, 4>}, {pipeline_mode = #tpu.pipeline_mode<synchronous>, transform_indices = @transform_3, window_bounds = array<i64: 16, 32>}, {pipeline_mode = #tpu.pipeline_mode<synchronous>, transform_indices = @transform_4, window_bounds = array<i64: 32, 32>}, {pipeline_mode = #tpu.pipeline_mode<synchronous>, transform_indices = @transform_5, window_bounds = array<i64: 32, 32>}, {pipeline_mode = #tpu.pipeline_mode<synchronous>, transform_indices = @transform_6, window_bounds = array<i64: 96, 64>}, {pipeline_mode = #tpu.pipeline_mode<synchronous>, transform_indices = @transform_7, window_bounds = array<i64: 1, 64>}, {pipeline_mode = #tpu.pipeline_mode<synchronous>, transform_indices = @transform_8, window_bounds = array<i64: 64, 128>}, {pipeline_mode = #tpu.pipeline_mode<synchronous>, transform_indices = @transform_9, window_bounds = array<i64: 1, 128>}, {transform_indices = @transform_10, window_bounds = array<i64: 16, 128>}]} {
    %0 = tpu.iota {dimensions = array<i32: 1>} : vector<16x32xi32>
    %c0 = arith.constant 0 : index
    %c0_0 = arith.constant 0 : index
    %1 = vector.load %arg2[%c0, %c0_0] : memref<16x1xi32, #tpu.memory_space<vmem>>, vector<16x1xi32>
    %2 = vector.broadcast %1 : vector<16x1xi32> to vector<16x32xi32>
    %3 = arith.cmpi eq, %0, %2 : vector<16x32xi32>
    %cst = arith.constant 1.000000e+00 : f32
    %cst_1 = arith.constant 0.000000e+00 : f32
    %4 = vector.broadcast %cst : f32 to vector<16x32xf32>
    %5 = vector.broadcast %cst_1 : f32 to vector<16x32xf32>
    %6 = arith.select %3, %4, %5 : vector<16x32xi1>, vector<16x32xf32>
    %7 = arith.truncf %6 : vector<16x32xf32> to vector<16x32xbf16>
    %c0_2 = arith.constant 0 : index
    %c0_3 = arith.constant 0 : index
    %8 = vector.load %arg3[%c0_2, %c0_3] : memref<16x4xi32, #tpu.memory_space<vmem>>, vector<16x4xi32>
    %cst_4 = arith.constant 0.000000e+00 : f32
    %9 = vector.broadcast %cst_4 : f32 to vector<16x32xf32>
    %10 = vector.extract_strided_slice %8 {offsets = [0, 0], sizes = [16, 1], strides = [1, 1]} : vector<16x4xi32> to vector<16x1xi32>
    %11 = vector.broadcast %10 : vector<16x1xi32> to vector<16x32xi32>
    %12 = arith.cmpi eq, %0, %11 : vector<16x32xi32>
    %cst_5 = arith.constant 1.000000e+00 : f32
    %cst_6 = arith.constant 0.000000e+00 : f32
    %13 = vector.broadcast %cst_5 : f32 to vector<16x32xf32>
    %14 = vector.broadcast %cst_6 : f32 to vector<16x32xf32>
    %15 = arith.select %12, %13, %14 : vector<16x32xi1>, vector<16x32xf32>
    %16 = arith.addf %9, %15 : vector<16x32xf32>
    %17 = vector.extract_strided_slice %8 {offsets = [0, 1], sizes = [16, 1], strides = [1, 1]} : vector<16x4xi32> to vector<16x1xi32>
    %18 = vector.broadcast %17 : vector<16x1xi32> to vector<16x32xi32>
    %19 = arith.cmpi eq, %0, %18 : vector<16x32xi32>
    %cst_7 = arith.constant 1.000000e+00 : f32
    %cst_8 = arith.constant 0.000000e+00 : f32
    %20 = vector.broadcast %cst_7 : f32 to vector<16x32xf32>
    %21 = vector.broadcast %cst_8 : f32 to vector<16x32xf32>
    %22 = arith.select %19, %20, %21 : vector<16x32xi1>, vector<16x32xf32>
    %23 = arith.addf %16, %22 : vector<16x32xf32>
    %24 = vector.extract_strided_slice %8 {offsets = [0, 2], sizes = [16, 1], strides = [1, 1]} : vector<16x4xi32> to vector<16x1xi32>
    %25 = vector.broadcast %24 : vector<16x1xi32> to vector<16x32xi32>
    %26 = arith.cmpi eq, %0, %25 : vector<16x32xi32>
    %cst_9 = arith.constant 1.000000e+00 : f32
    %cst_10 = arith.constant 0.000000e+00 : f32
    %27 = vector.broadcast %cst_9 : f32 to vector<16x32xf32>
    %28 = vector.broadcast %cst_10 : f32 to vector<16x32xf32>
    %29 = arith.select %26, %27, %28 : vector<16x32xi1>, vector<16x32xf32>
    %30 = arith.addf %23, %29 : vector<16x32xf32>
    %31 = vector.extract_strided_slice %8 {offsets = [0, 3], sizes = [16, 1], strides = [1, 1]} : vector<16x4xi32> to vector<16x1xi32>
    %32 = vector.broadcast %31 : vector<16x1xi32> to vector<16x32xi32>
    %33 = arith.cmpi eq, %0, %32 : vector<16x32xi32>
    %cst_11 = arith.constant 1.000000e+00 : f32
    %cst_12 = arith.constant 0.000000e+00 : f32
    %34 = vector.broadcast %cst_11 : f32 to vector<16x32xf32>
    %35 = vector.broadcast %cst_12 : f32 to vector<16x32xf32>
    %36 = arith.select %33, %34, %35 : vector<16x32xi1>, vector<16x32xf32>
    %37 = arith.addf %30, %36 : vector<16x32xf32>
    %38 = arith.truncf %37 : vector<16x32xf32> to vector<16x32xbf16>
    %c0_13 = arith.constant 0 : index
    %c0_14 = arith.constant 0 : index
    %39 = vector.load %arg1[%c0_13, %c0_14] : memref<16x16xbf16, #tpu.memory_space<vmem>>, vector<16x16xbf16>
    %c0_15 = arith.constant 0 : index
    %c0_16 = arith.constant 0 : index
    %40 = vector.load %arg4[%c0_15, %c0_16] : memref<16x32xbf16, #tpu.memory_space<vmem>>, vector<16x32xbf16>
    %cst_17 = arith.constant dense<0.000000e+00> : vector<16x32xf32>
    %41 = tpu.matmul %39, %40, %cst_17 {dimension_numbers = #tpu.dot_dimension_numbers<[1], [0], [0], [1], [0, 0, 1, 1], [], []>} : vector<16x16xbf16>, vector<16x32xbf16>, vector<16x32xf32> -> vector<16x32xf32>
    %c0_18 = arith.constant 0 : index
    %c0_19 = arith.constant 0 : index
    %42 = vector.load %arg5[%c0_18, %c0_19] : memref<32x32xbf16, #tpu.memory_space<vmem>>, vector<32x32xbf16>
    %cst_20 = arith.constant dense<0.000000e+00> : vector<16x32xf32>
    %43 = tpu.matmul %7, %42, %cst_20 {dimension_numbers = #tpu.dot_dimension_numbers<[1], [0], [0], [1], [0, 0, 1, 1], [], []>} : vector<16x32xbf16>, vector<32x32xbf16>, vector<16x32xf32> -> vector<16x32xf32>
    %c0_21 = arith.constant 0 : index
    %c0_22 = arith.constant 0 : index
    %44 = vector.load %arg6[%c0_21, %c0_22] : memref<32x32xbf16, #tpu.memory_space<vmem>>, vector<32x32xbf16>
    %cst_23 = arith.constant dense<0.000000e+00> : vector<16x32xf32>
    %45 = tpu.matmul %38, %44, %cst_23 {dimension_numbers = #tpu.dot_dimension_numbers<[1], [0], [0], [1], [0, 0, 1, 1], [], []>} : vector<16x32xbf16>, vector<32x32xbf16>, vector<16x32xf32> -> vector<16x32xf32>
    %46 = arith.truncf %41 : vector<16x32xf32> to vector<16x32xbf16>
    %c0_24 = arith.constant 0 : index
    %c0_25 = arith.constant 0 : index
    %47 = vector.load %arg12[%c0_24, %c0_25] : memref<16x96xbf16, #tpu.memory_space<vmem>>, vector<16x32xbf16>
    tpu.vector_store %arg12[%c0_24, %c0_25], %46 {strides = array<i32>} : memref<16x96xbf16, #tpu.memory_space<vmem>>, vector<16x32xbf16>,
    %48 = arith.truncf %43 : vector<16x32xf32> to vector<16x32xbf16>
    %c0_26 = arith.constant 0 : index
    %c32 = arith.constant 32 : index
    %49 = vector.load %arg12[%c0_26, %c32] : memref<16x96xbf16, #tpu.memory_space<vmem>>, vector<16x32xbf16>
    tpu.vector_store %arg12[%c0_26, %c32], %48 {strides = array<i32>} : memref<16x96xbf16, #tpu.memory_space<vmem>>, vector<16x32xbf16>,
    %50 = arith.truncf %45 : vector<16x32xf32> to vector<16x32xbf16>
    %c0_27 = arith.constant 0 : index
    %c64 = arith.constant 64 : index
    %51 = vector.load %arg12[%c0_27, %c64] : memref<16x96xbf16, #tpu.memory_space<vmem>>, vector<16x32xbf16>
    tpu.vector_store %arg12[%c0_27, %c64], %50 {strides = array<i32>} : memref<16x96xbf16, #tpu.memory_space<vmem>>, vector<16x32xbf16>,
    %c0_28 = arith.constant 0 : index
    %c0_29 = arith.constant 0 : index
    %52 = vector.load %arg12[%c0_28, %c0_29] : memref<16x96xbf16, #tpu.memory_space<vmem>>, vector<16x96xbf16>
    %c0_30 = arith.constant 0 : index
    %c0_31 = arith.constant 0 : index
    %53 = vector.load %arg7[%c0_30, %c0_31] : memref<96x64xbf16, #tpu.memory_space<vmem>>, vector<96x64xbf16>
    %cst_32 = arith.constant dense<0.000000e+00> : vector<16x64xf32>
    %54 = tpu.matmul %52, %53, %cst_32 {dimension_numbers = #tpu.dot_dimension_numbers<[1], [0], [0], [1], [0, 0, 1, 1], [], []>} : vector<16x96xbf16>, vector<96x64xbf16>, vector<16x64xf32> -> vector<16x64xf32>
    %c0_33 = arith.constant 0 : index
    %c0_34 = arith.constant 0 : index
    %55 = vector.load %arg8[%c0_33, %c0_34] : memref<1x64xf32, #tpu.memory_space<vmem>>, vector<1x64xf32>
    %56 = vector.broadcast %55 : vector<1x64xf32> to vector<16x64xf32>
    %57 = arith.addf %54, %56 : vector<16x64xf32>
    %cst_35 = arith.constant 0.000000e+00 : f32
    %58 = vector.broadcast %cst_35 : f32 to vector<16x64xf32>
    %59 = arith.maximumf %57, %58 : vector<16x64xf32>
    %60 = arith.truncf %59 : vector<16x64xf32> to vector<16x64xbf16>
    %c0_36 = arith.constant 0 : index
    %c0_37 = arith.constant 0 : index
    %61 = vector.load %arg9[%c0_36, %c0_37] : memref<64x128xbf16, #tpu.memory_space<vmem>>, vector<64x128xbf16>
    %cst_38 = arith.constant dense<0.000000e+00> : vector<16x128xf32>
    %62 = tpu.matmul %60, %61, %cst_38 {dimension_numbers = #tpu.dot_dimension_numbers<[1], [0], [0], [1], [0, 0, 1, 1], [], []>} : vector<16x64xbf16>, vector<64x128xbf16>, vector<16x128xf32> -> vector<16x128xf32>
    %c0_39 = arith.constant 0 : index
    %c0_40 = arith.constant 0 : index
    %63 = vector.load %arg10[%c0_39, %c0_40] : memref<1x128xf32, #tpu.memory_space<vmem>>, vector<1x128xf32>
    %64 = vector.broadcast %63 : vector<1x128xf32> to vector<16x128xf32>
    %65 = arith.addf %62, %64 : vector<16x128xf32>
    %c0_41 = arith.constant 0 : index
    %c0_42 = arith.constant 0 : index
    %66 = vector.load %arg11[%c0_41, %c0_42] : memref<16x128xf32, #tpu.memory_space<vmem>>, vector<16x128xf32>
    tpu.vector_store %arg11[%c0_41, %c0_42], %65 {strides = array<i32>} : memref<16x128xf32, #tpu.memory_space<vmem>>, vector<16x128xf32>,
    return
  }
  func.func @transform_0(%arg0: i32) -> (i32, i32) {
    %c0_i32 = arith.constant 0 : i32
    %c0_i32_0 = arith.constant 0 : i32
    return %arg0, %c0_i32 : i32, i32
  }
  func.func @transform_1(%arg0: i32) -> (i32, i32) {
    %c0_i32 = arith.constant 0 : i32
    %c0_i32_0 = arith.constant 0 : i32
    return %arg0, %c0_i32 : i32, i32
  }
  func.func @transform_2(%arg0: i32) -> (i32, i32) {
    %c0_i32 = arith.constant 0 : i32
    %c0_i32_0 = arith.constant 0 : i32
    return %arg0, %c0_i32 : i32, i32
  }
  func.func @transform_3(%arg0: i32) -> (i32, i32) {
    %c0_i32 = arith.constant 0 : i32
    %c0_i32_0 = arith.constant 0 : i32
    %c0_i32_1 = arith.constant 0 : i32
    return %c0_i32, %c0_i32_0 : i32, i32
  }
  func.func @transform_4(%arg0: i32) -> (i32, i32) {
    %c0_i32 = arith.constant 0 : i32
    %c0_i32_0 = arith.constant 0 : i32
    %c0_i32_1 = arith.constant 0 : i32
    return %c0_i32, %c0_i32_0 : i32, i32
  }
  func.func @transform_5(%arg0: i32) -> (i32, i32) {
    %c0_i32 = arith.constant 0 : i32
    %c0_i32_0 = arith.constant 0 : i32
    %c0_i32_1 = arith.constant 0 : i32
    return %c0_i32, %c0_i32_0 : i32, i32
  }
  func.func @transform_6(%arg0: i32) -> (i32, i32) {
    %c0_i32 = arith.constant 0 : i32
    %c0_i32_0 = arith.constant 0 : i32
    %c0_i32_1 = arith.constant 0 : i32
    return %c0_i32, %c0_i32_0 : i32, i32
  }
  func.func @transform_7(%arg0: i32) -> (i32, i32) {
    %c0_i32 = arith.constant 0 : i32
    %c0_i32_0 = arith.constant 0 : i32
    %c0_i32_1 = arith.constant 0 : i32
    return %c0_i32, %c0_i32_0 : i32, i32
  }
  func.func @transform_8(%arg0: i32) -> (i32, i32) {
    %c0_i32 = arith.constant 0 : i32
    %c0_i32_0 = arith.constant 0 : i32
    %c0_i32_1 = arith.constant 0 : i32
    return %c0_i32, %c0_i32_0 : i32, i32
  }
  func.func @transform_9(%arg0: i32) -> (i32, i32) {
    %c0_i32 = arith.constant 0 : i32
    %c0_i32_0 = arith.constant 0 : i32
    %c0_i32_1 = arith.constant 0 : i32
    return %c0_i32, %c0_i32_0 : i32, i32
  }
  func.func @transform_10(%arg0: i32) -> (i32, i32) {
    %c0_i32 = arith.constant 0 : i32
    %c0_i32_0 = arith.constant 0 : i32
    return %arg0, %c0_i32 : i32, i32
  }
}

</mosaic_0001>

<bundles_post_ra>
// kernel: tpu_custom_call.1
= control target key start
LH: loop header
LB: loop body
LE: loop exit
PB: predicated region body
PF: predicated region fallthrough
CT: control target
= control target key end

     0   :  { %v657_v1 = vmov 1   ;;  %v658_v2 = vmov 0   ;;  %v659_v4 = vmov 0.0   ;;  %v660_v6 = vmov 2   ;;  %s839_s0 = inlined_call_operand.vmem [shape: bf16[16,16], index: 0, kind: input, shape index: {}]   ;;  %s840_s1 = inlined_call_operand.vmem [shape: s32[16,1], index: 1, kind: input, shape index: {}]   ;;  %s841_s2 = inlined_call_operand.vmem [shape: s32[16,4], index: 2, kind: input, shape index: {}]   ;;  %s842_s3 = inlined_call_operand.vmem [shape: bf16[16,32], index: 3, kind: input, shape index: {}]   ;;  %s843_s4 = inlined_call_operand.vmem [shape: bf16[32,32], index: 4, kind: input, shape index: {}]   ;;  %s844_s5 = inlined_call_operand.vmem [shape: bf16[32,32], index: 5, kind: input, shape index: {}]   ;;  %s845_s6 = inlined_call_operand.vmem [shape: bf16[96,64], index: 6, kind: input, shape index: {}]   ;;  %s846_s7 = inlined_call_operand.vmem [shape: f32[1,64], index: 7, kind: input, shape index: {}]   ;;  %s847_s8 = inlined_call_operand.vmem [shape: bf16[64,128], index: 8, kind: input, shape index: {}]   ;;  %s848_s9 = inlined_call_operand.vmem [shape: f32[1,128], index: 9, kind: input, shape index: {}]   ;;  %s849_s10 = inlined_call_operand.hbm [shape: f32[16,128], index: 10, kind: output, shape index: {}]  }
   0x1   :  { %v52_v0 = vld [vmem:[%s841_s2] sm:$0xff]  ;;  %611 = vset.pattern.permute.xlu1 %v657_v1  ;;  %610 = vset.pattern.permute.xlu0 %v658_v2  ;;  %v53_v3 = vld [vmem:[%s841_s2 + $0x8] sm:$0xff]  ;;  %vm661_vm0 = vmmov 0  }
   0x2   :  { %67 = vperm.xlu1 %611, %v52_v0   ;;  %55 = vperm.xlu0 %610, %v52_v0   ;;  %v617_v5 = vld [vmem:[%s842_s3] sm:$0xff]  }
   0x3   :  { %549 = vmatprep.subr.bf16.mxu0 %v659_v4  ;;  %555 = vmatprep.subr.bf16.mxu1 %v659_v4  ;;  %v618_v7 = vld [vmem:[%s839_s0] sm:$0xff]  }
   0x4   :  { %550 = vmatpush3.bf16.msra.mxu0 %v617_v5  ;;  %551 = vmatprep.mubr.msk.bf16.mxu0 %vm661_vm0, %v659_v4 }
   0x5   :  { %563 = vmatprep.subr.bf16.mxu0 %v659_v4 }
   0x6   :  { %70 = vperm.xlu1 %611, %v53_v3   ;;  %58 = vperm.xlu0 %610, %v53_v3  }
   0xa   :  { %613 = vset.pattern.permute.xlu1 %v660_v6  ;;  %612 = vset.pattern.permute.xlu0 %v660_v6 }
   0xb   :  { %82 = vperm.xlu1 %613, %v53_v3   ;;  %79 = vperm.xlu0 %612, %v52_v0  }
   0xc   :  { %15 = vsyncpa [#allocation4], 0  ;;  %vm118_vm1 = vcmask 130048   ;;  %v619_v8 = vld [vmem:[%s844_s5] sm:$0xff]   ;;  %559 = vmatprep.mubr.msk.bf16.mxu1 %vm661_vm0, %v659_v4  ;;  %v662_v9 = vmov 3   ;;  %v620_v11 = vld [vmem:[%s844_s5 + $0x8] sm:$0xff]   ;;  %v37_v15 = vlaneseq }
   0xd   :  { %552 = vmatmul.mubr.msk.bf16.vlgmr.msra.gmra.mrb[0].mxu0 %vm118_vm1, %v618_v7  ;;  %v39_v10 = vld [vmem:[%s840_s1] sm:$0xff]  ;;  %v40_v13 = vld [vmem:[%s840_s1 + $0x8] sm:$0xff]  ;;  %vm179_vm10 = vcmask 261120   ;;  %v625_v52 = vld [vmem:[%s845_s6 + $0x10] sm:$0xff]   ;;  %s663_s2 = smov 64   ;;  %s664_s21 = smov 32  }
   0xe   :  { %564 = vmatpush3.bf16.msra.mxu0 %v619_v8  ;;  %567 = vmatprep.mubr.msk.bf16.mxu0 %vm661_vm0, %v659_v4  ;;  %v621_v12 = vld [vmem:[%s843_s4] sm:$0xff]   ;;  %v622_v14 = vld [vmem:[%s843_s4 + $0x8] sm:$0xff]   ;;  %v38_v18 = vand.u32 127, %v37_v15  ;;  %v626_v53 = vld [vmem:[%s845_s6 + $0x18] sm:$0xff]   ;;  %vm291_vm13 = vcmask 523520   ;;  %vm298_vm14 = vcmask 785920  }
   0xf   :  { %614 = vset.pattern.permute.xlu1 %v662_v9  ;;  %615 = vset.pattern.permute.xlu0 %v662_v9  ;;  %v623_v50 = vld [vmem:[%s845_s6] sm:$0xff]   ;;  %v624_v51 = vld [vmem:[%s845_s6 + $0x8] sm:$0xff]   ;;  %vm356_vm15 = vcmask 785408   ;;  %v631_v8 = vld [vmem:[%s847_s8 + $0x10] sm:$0xff]  }
  0x10   :  { %91 = vperm.xlu1 %614, %v52_v0   ;;  %94 = vperm.xlu0 %615, %v53_v3   ;;  %v627_v54 = vld [vmem:[%s845_s6 + $0x20] sm:$0xff]   ;;  %v628_v57 = vld [vmem:[%s845_s6 + $0x28] sm:$0xff]   ;;  %v632_v9 = vld [vmem:[%s847_s8 + $0x18] sm:$0xff]  }
  0x11   :  { %565 = vmatprep.subr.bf16.mxu0 %v659_v4  ;;  %556 = vmatpush3.bf16.msra.mxu1 %v621_v12  ;;  %v629_v63 = vld [vmem:[%s847_s8] sm:$0xff]   ;;  %v630_v3 = vld [vmem:[%s847_s8 + $0x8] sm:$0xff]   ;;  %s665_s8 = smov [#allocation3]  }
  0x12   :  { %566 = vmatpush3.bf16.msra.mxu0 %v620_v11  ;;  %557 = vmatprep.subr.bf16.mxu1 %v659_v4  ;;  %s495_s28 = sshll.u32 %s665_s8, 4  ;;  %s496_s28 = int_to_ptr.vmem [resolvable:$true] %s495_s28 }
  0x13   :  { %587 = vmatprep.subr.bf16.mxu0 %v659_v4  ;;  %p638_p1 = scmp.lt.s32.totalorder %s496_s28, %s496_s28 }
  0x14   :  { %616 = vset.pattern.permute.xlu1 %v658_v2 }
  0x15   :  { %42 = vperm.xlu1 %616, %v39_v10   ;;  %558 = vmatpush3.bf16.msra.mxu1 %v622_v14  ;;  %v515_v10 = vld [vmem:[%s846_s7] ss:$0 sm:$0xff]  ;;  %s633_s7 = scalar_lea.vmem %s496_s28, 256 }
  0x16   :  { %571 = vmatprep.subr.bf16.mxu1 %v659_v4  ;;  %p634_p0 = scmp.ne.s32.totalorder %s496_s28, %s633_s7  ;;  %p639_p2 = scmp.lt.s32.totalorder %s633_s7, %s633_s7 }
  0x18   :  { %p640_p3 = por %p639_p2, %p638_p1 }
  0x19   :  { %45 = vperm.xlu1 %616, %v40_v13  }
  0x1a   :  { %p641_p4 = pnand %p640_p3, %p634_p0 }
  0x81   :  { %v68_v16 = vpop.permute.xlu1 %67  ;;  %v56_v17 = vpop.permute.xlu0 %55 }
  0x82   :  { %vm72_vm2 = vcmp.eq.s32.totalorder %v38_v18, %v68_v16  ;;  %vm60_vm3 = vcmp.eq.s32.totalorder %v38_v18, %v56_v17 }
  0x83   :  { %v74_v21 = vsel %vm72_vm2, 1.0, %v659_v4  ;;  %v62_v22 = vsel %vm60_vm3, 1.0, %v659_v4 }
  0x84   :  { %v76_v29 = vadd.f32 %v74_v21, %v62_v22 }
  0x85   :  { %v71_v19 = vpop.permute.xlu1 %70  ;;  %v59_v20 = vpop.permute.xlu0 %58 }
  0x86   :  { %vm73_vm4 = vcmp.eq.s32.totalorder %v38_v18, %v71_v19  ;;  %vm61_vm5 = vcmp.eq.s32.totalorder %v38_v18, %v59_v20 }
  0x87   :  { %v75_v25 = vsel %vm73_vm4, 1.0, %v659_v4  ;;  %v63_v26 = vsel %vm61_vm5, 1.0, %v659_v4 }
  0x88   :  { %v77_v30 = vadd.f32 %v75_v25, %v63_v26 }
  0x8a   :  { %v83_v23 = vpop.permute.xlu1 %82  ;;  %v80_v24 = vpop.permute.xlu0 %79 }
  0x8b   :  { %vm85_vm6 = vcmp.eq.s32.totalorder %v38_v18, %v83_v23  ;;  %vm84_vm7 = vcmp.eq.s32.totalorder %v38_v18, %v80_v24 }
  0x8c   :  { %v87_v27 = vsel %vm85_vm6, 1.0, %v659_v4  ;;  %v86_v28 = vsel %vm84_vm7, 1.0, %v659_v4 }
  0x8d   :  { %v89_v33 = vadd.f32 %v87_v27, %v77_v30  ;;  %v88_v34 = vadd.f32 %v86_v28, %v76_v29 }
  0x8f   :  { %v92_v31 = vpop.permute.xlu1 %91  ;;  %v95_v32 = vpop.permute.xlu0 %94 }
  0x90   :  { %vm96_vm8 = vcmp.eq.s32.totalorder %v38_v18, %v92_v31  ;;  %vm97_vm9 = vcmp.eq.s32.totalorder %v38_v18, %v95_v32 }
  0x91   :  { %v98_v35 = vsel %vm96_vm8, 1.0, %v659_v4  ;;  %v99_v36 = vsel %vm97_vm9, 1.0, %v659_v4 }
  0x92   :  { %v100_v37 = vadd.f32 %v98_v35, %v88_v34  ;;  %v101_v38 = vadd.f32 %v99_v36, %v89_v33 }
  0x94   :  { %v102_v39 = vpack.c.bf16 %v101_v38, %v100_v37  ;;  %v43_v40 = vpop.permute.xlu1 %42 }
  0x95   :  { %vm47_vm11 = vcmp.eq.s32.totalorder %v38_v18, %v43_v40 }
  0x96   :  { %568 = vmatmul.mubr.msk.bf16.vlgmr.msra.gmra.mrb[4].mxu0 %vm179_vm10, %v102_v39  ;;  %v49_v42 = vsel %vm47_vm11, 1.0, %v659_v4 }
  0x97   :  { %595 = vmatprep.mubr.msk.bf16.mxu0 %vm661_vm0, %v659_v4  ;;  %588 = vmatpush3.bf16.msra.mxu0 %v629_v63 }
  0x98   :  { %v46_v41 = vpop.permute.xlu1 %45  ;;  %589 = vmatprep.subr.bf16.mxu0 %v659_v4 }
  0x99   :  { %vm48_vm12 = vcmp.eq.s32.totalorder %v38_v18, %v46_v41 }
  0x9a   :  { %v50_v43 = vsel %vm48_vm12, 1.0, %v659_v4 }
  0x9b   :  { %v51_v44 = vpack.c.bf16 %v50_v43, %v49_v42  ;;  %590 = vmatpush3.bf16.msra.mxu0 %v630_v3 }
  0x9c   :  { %591 = vmatprep.subr.bf16.mxu0 %v659_v4 }
  0x9d   :  { %560 = vmatmul.mubr.msk.bf16.vlgmr.msra.gmra.mrb[0].mxu1 %vm179_vm10, %v51_v44 }
  0x9e   :  { %583 = vmatprep.mubr.msk.bf16.mxu1 %vm661_vm0, %v659_v4  ;;  %572 = vmatpush3.bf16.msra.mxu1 %v623_v50  ;;  %vm443_vm0 = vcmask 523264  }
  0x9f   :  { %573 = vmatprep.subr.bf16.mxu1 %v659_v4  ;;  %592 = vmatpush3.bf16.msra.mxu0 %v631_v8 }
  0xa0   :  { %593 = vmatprep.subr.bf16.mxu0 %v659_v4 }
  0xa2   :  { %574 = vmatpush3.bf16.msra.mxu1 %v624_v51 }
  0xa3   :  { %575 = vmatprep.subr.bf16.mxu1 %v659_v4  ;;  %594 = vmatpush3.bf16.msra.mxu0 %v632_v9 }
  0xa6   :  { %576 = vmatpush3.bf16.msra.mxu1 %v625_v52 }
  0xa7   :  { %577 = vmatprep.subr.bf16.mxu1 %v659_v4 }
  0xaa   :  { %578 = vmatpush3.bf16.msra.mxu1 %v626_v53 }
  0xab   :  { %579 = vmatprep.subr.bf16.mxu1 %v659_v4 }
  0xae   :  { %580 = vmatpush3.bf16.msra.mxu1 %v627_v54 }
  0xaf   :  { %581 = vmatprep.subr.bf16.mxu1 %v659_v4  ;;  %v523_v4 = vld [vmem:[%s848_s9] ss:$0 sm:$0xff] }
  0xb2   :  { %582 = vmatpush3.bf16.msra.mxu1 %v628_v57 }
  0xe0   :  { %v156_v45 = vpop.f32.mrb[0].mxu0 }
  0xe1   :  { %v553_v46 = vpop.f32.mrb[1].mxu0 }
  0xe2   :  { %v159_v47 = vpop.f32.mrb[2].mxu0 }
  0xe3   :  { %v284_v48 = vpack.c.bf16 %v159_v47, %v156_v45  ;;  %v554_v49 = vpop.f32.mrb[3].mxu0 }
  0xe5   :  { %285 = vst.msk [vmem:[#allocation2] sm:$0xff] %vm179_vm10, %v284_v48 }
 0x169   :  { %v277_v55 = vpop.f32.mrb[4].mxu0 }
 0x16a   :  { %v569_v56 = vpop.f32.mrb[5].mxu0 }
 0x16b   :  { %v280_v58 = vpop.f32.mrb[6].mxu0 }
 0x16c   :  { %v293_v59 = vpack.c.bf16 %v280_v58, %v277_v55  ;;  %v570_v60 = vpop.f32.mrb[7].mxu0 }
 0x16e   :  { %295 = vrot.lane.b32.xlu1 %v293_v59, %s663_s2 }
 0x170   :  { %v217_v61 = vpop.f32.mrb[0].mxu1 }
 0x171   :  { %v561_v62 = vpop.f32.mrb[1].mxu1 }
 0x172   :  { %v220_v0 = vpop.f32.mrb[2].mxu1 }
 0x173   :  { %v286_v1 = vpack.c.bf16 %v220_v0, %v217_v61  ;;  %v562_v2 = vpop.f32.mrb[3].mxu1 }
 0x175   :  { %288 = vrot.lane.b32.xlu0 %v286_v1, %s664_s21 }
 0x1e0   :  { %v296_v6 = vpop.permute.xlu1 %295 }
 0x1e7   :  { %v289_v5 = vpop.permute.xlu0 %288 }
 0x1e8   :  { %292 = vst.msk [vmem:[#allocation2] sm:$0xff] %vm291_vm13, %v289_v5 }
 0x1e9   :  { %299 = vst.msk [vmem:[#allocation2] sm:$0xff] %vm298_vm14, %v296_v6 }
 0x1f0   :  { %v300_v7 = vld [vmem:[#allocation2] sm:$0xff] }
 0x1f1   :  { %584 = vmatmul.mubr.msk.bf16.vlgmr.msra.gmra.mrb[4].mxu1 %vm356_vm15, %v300_v7 }
 0x2c4   :  { %v394_v11 = vpop.f32.mrb[4].mxu1 }
 0x2c5   :  { %v395_v12 = vadd.f32 %v515_v10, %v394_v11  ;;  %v585_v13 = vpop.f32.mrb[5].mxu1 }
 0x2c6   :  { %v397_v14 = vpop.f32.mrb[6].mxu1 }
 0x2c7   :  { %v398_v15 = vadd.f32 %v515_v10, %v397_v14  ;;  %v586_v16 = vpop.f32.mrb[7].mxu1  ;;  %v401_v17 = vmax.f32 %v395_v12, 0.0 }
 0x2c9   :  { %v402_v18 = vmax.f32 %v398_v15, 0.0 }
 0x2cb   :  { %v403_v19 = vpack.c.bf16 %v402_v18, %v401_v17 }
 0x2cd   :  { %596 = vmatmul.mubr.msk.bf16.vlgmr.msra.gmra.mrb[8].mxu0 %vm443_vm0, %v403_v19 }
 0x3a0   :  { %v481_v20 = vpop.f32.mrb[8].mxu0 }
 0x3a1   :  { %v482_v21 = vadd.f32 %v523_v4, %v481_v20  ;;  %v597_v22 = vpop.f32.mrb[9].mxu0 }
 0x3a2   :  { %v484_v23 = vpop.f32.mrb[10].mxu0 }
 0x3a3   :  { %488 = vst [vmem:[#allocation3] sm:$0xff] %v482_v21  ;;  %v485_v24 = vadd.f32 %v523_v4, %v484_v23  ;;  %v598_v25 = vpop.f32.mrb[11].mxu0 }
 0x3a5   :  { %489 = vst [vmem:[#allocation3 + $0x8] sm:$0xff] %v485_v24 }
 0x3a6   :  { %644 = shalt.err (!%p641_p4)
}
 0x3a7   :  { %s645_s4 = scalar_lea.hbm %s849_s10, 256 }
 0x3a8   :  { %p646_p5 = scmp.ne.s32.totalorder %s849_s10, %s645_s4  ;;  %p649_p6 = scmp.lt.u32.totalorder %s645_s4, %s849_s10 }
 0x3aa   :  { %p651_p7 = pnand %p649_p6, %p646_p5 }
 0x3ac   :  { %654 = shalt.err (!%p651_p7)
}
 0x3ad   :  { %s666_s13 = smov 128   ;;  %s667_s14 = smov 8  }
 0x3ae   :  { %501 = dma.vmem_to_hbm [thread:$0]  %s496_s28, 256, %s849_s10, [#allocation4], %s666_s13, %s666_s13, %s667_s14  }
 0x3af   :  { %655 = dma.done.wait [#allocation4], 256  }
 0x3b0   :  { %656 = vsyncadd [#allocation4], 4294967040 }
 0x3b1   :  { %505 = vsyncpa [#allocation4], 1 }

</bundles_post_ra>
